<compile_context>
chip_gen: v7x
topology: tpu7x:2x2x1
jax: 0.10.0
libtpu: 0.0.40
codegen_flags: <defaults>
</compile_context>

<pallas_src>
import jax
import jax.numpy as jnp
from jax.experimental import pallas as pl
from jax.experimental.pallas import tpu as pltpu

H1 = 128       # fc1 out features
H2 = 32        # fc2 out features (logical)
H2_PAD = 128   # fc2 out features padded to a full lane/MXU tile (zeros in pad)


def mlp_kernel(x_ref, w1_ref, w2_ref, w3_ref, b_ref, o_ref):
    nc = o_ref.shape[1]
    x = x_ref[...]
    h1 = jnp.dot(x, w1_ref[...], preferred_element_type=jnp.float32) + b_ref[0:1, :]
    h1 = jnp.maximum(h1, 0.0)
    h2 = jnp.dot(h1, w2_ref[...], preferred_element_type=jnp.float32) + b_ref[1:2, :]
    h2 = jnp.maximum(h2, 0.0)
    out = jnp.dot(h2, w3_ref[...], preferred_element_type=jnp.float32) + b_ref[2:3, :nc]
    o_ref[...] = out.astype(o_ref.dtype)


def prepare_params(params):
    """One-time layout glue (hoisted out of the per-call forward path)."""
    w1, b1, w2, b2, w3, b3 = params
    num_class = w3.shape[0]
    input_len = w1.shape[1]

    w1t = w1.T.astype(jnp.float32)                                       # (input_len, 128)
    w2t = jnp.zeros((H1, H2_PAD), jnp.float32).at[:, :H2].set(w2.T)      # (128, 128)
    w3t = jnp.zeros((H2_PAD, num_class), jnp.float32).at[:H2, :].set(w3.T)  # (128, nc)
    b_pack = jnp.zeros((3, 128), jnp.float32)
    b_pack = b_pack.at[0, :H1].set(b1)
    b_pack = b_pack.at[1, :H2].set(b2)
    b_pack = b_pack.at[2, :num_class].set(b3)
    return (w1t, w2t, w3t, b_pack, num_class, input_len)


def _round_up(x, m):
    return ((x + m - 1) // m) * m


def _choose_tb(B, input_len):
    """Batch tile: big enough to amortize per-step overhead, small enough for
    >=2 grid steps (v7x megacore) and comfortable VMEM (v7x: 64 MiB physical)."""
    if B < 16:
        return B  # single full-extent tile (block == full dim is always legal)
    rows_by_vmem = max(8, (16 << 20) // (2 * 4 * max(input_len, 1)))  # ~16 MiB for x dbl-buf
    tb = min(2048, rows_by_vmem, _round_up(pl.cdiv(B, 2), 8))
    return max(8, (tb // 8) * 8)


def mlp_forward(x, prepared):
    """Equivalent of Model.forward: x.view(-1, input_len) -> fc1 -> relu -> fc2 -> relu -> out."""
    w1t, w2t, w3t, b_pack, num_class, input_len = prepared
    xb = x.reshape(-1, input_len).astype(jnp.float32)
    B = xb.shape[0]

    TB = _choose_tb(B, input_len)
    grid = (pl.cdiv(B, TB),)

    flops = 2 * B * (input_len * H1 + H1 * H2_PAD + H2_PAD * num_class)
    bytes_accessed = 4 * (
        B * input_len + B * num_class
        + input_len * H1 + H1 * H2_PAD + H2_PAD * num_class + 3 * 128
    )
    cost = pl.CostEstimate(flops=flops, transcendentals=0, bytes_accessed=bytes_accessed)

    out = pl.pallas_call(
        mlp_kernel,
        out_shape=jax.ShapeDtypeStruct((B, num_class), jnp.float32),
        grid=grid,
        in_specs=[
            pl.BlockSpec((TB, input_len), lambda i: (i, 0)),      # x: streamed per batch tile
            pl.BlockSpec((input_len, H1), lambda i: (0, 0)),      # weights/biases: VMEM resident
            pl.BlockSpec((H1, H2_PAD), lambda i: (0, 0)),
            pl.BlockSpec((H2_PAD, num_class), lambda i: (0, 0)),
            pl.BlockSpec((3, 128), lambda i: (0, 0)),
        ],
        out_specs=pl.BlockSpec((TB, num_class), lambda i: (i, 0)),  # unpadded output width
        compiler_params=pltpu.CompilerParams(
            dimension_semantics=("parallel",),
        ),
        cost_estimate=cost,
    )(xb, w1t, w2t, w3t, b_pack)

    return out


def init_params(key, num_class, input_len):
    """Deterministic init matching nn.Linear shapes (weight: (out,in), bias: (out,))."""
    ks = jax.random.split(key, 6)

    def linear_init(kw, kb, fan_in, fan_out):
        bound = 1.0 / jnp.sqrt(fan_in)
        w = jax.random.uniform(kw, (fan_out, fan_in), jnp.float32, -bound, bound)
        b = jax.random.uniform(kb, (fan_out,), jnp.float32, -bound, bound)
        return w, b

    w1, b1 = linear_init(ks[0], ks[1], input_len, H1)
    w2, b2 = linear_init(ks[2], ks[3], H1, H2)
    w3, b3 = linear_init(ks[4], ks[5], H2, num_class)
    return (w1, b1, w2, b2, w3, b3)


if __name__ == "__main__":
    num_class = 10
    input_len = 64
    batch = 8

    key = jax.random.PRNGKey(0)
    kx, kp = jax.random.split(key)
    x = jax.random.normal(kx, (batch, input_len), jnp.float32)
    params = init_params(kp, num_class, input_len)

    prepared = prepare_params(params)          # one-time weight packing
    out = mlp_forward(x, prepared)
    out = jax.block_until_ready(out)

    # Reference check in plain JAX (same math as the PyTorch module).
    w1, b1, w2, b2, w3, b3 = params
    h1 = jnp.maximum(x.reshape(-1, input_len) @ w1.T + b1, 0.0)
    h2 = jnp.maximum(h1 @ w2.T + b2, 0.0)
    ref = h2 @ w3.T + b3
    assert out.shape == (batch, num_class)
    assert jnp.allclose(out, ref, atol=1e-4, rtol=1e-4)

    print("KERNEL_OK")
</pallas_src>

<mosaic_0001>
module attributes {stable_mosaic.version = 11 : i64} {
  func.func @mlp_kernel(%arg0: i32, %arg1: memref<8x64xf32, #tpu.memory_space<vmem>>, %arg2: memref<64x128xf32, #tpu.memory_space<vmem>>, %arg3: memref<128x128xf32, #tpu.memory_space<vmem>>, %arg4: memref<128x10xf32, #tpu.memory_space<vmem>>, %arg5: memref<3x128xf32, #tpu.memory_space<vmem>>, %arg6: memref<8x10xf32, #tpu.memory_space<vmem>>) attributes {dimension_semantics = [#tpu.dimension_semantics<parallel>], iteration_bounds = array<i64: 1>, scalar_prefetch = 0 : i64, scratch_operands = 0 : i64, tpu.core_type = #tpu.core_type<tc>, window_params = [{transform_indices = @transform_0, window_bounds = array<i64: 8, 64>}, {pipeline_mode = #tpu.pipeline_mode<synchronous>, transform_indices = @transform_1, window_bounds = array<i64: 64, 128>}, {pipeline_mode = #tpu.pipeline_mode<synchronous>, transform_indices = @transform_2, window_bounds = array<i64: 128, 128>}, {pipeline_mode = #tpu.pipeline_mode<synchronous>, transform_indices = @transform_3, window_bounds = array<i64: 128, 10>}, {pipeline_mode = #tpu.pipeline_mode<synchronous>, transform_indices = @transform_4, window_bounds = array<i64: 3, 128>}, {transform_indices = @transform_5, window_bounds = array<i64: 8, 10>}]} {
    %c0 = arith.constant 0 : index
    %c0_0 = arith.constant 0 : index
    %0 = vector.load %arg1[%c0, %c0_0] : memref<8x64xf32, #tpu.memory_space<vmem>>, vector<8x64xf32>
    %c0_1 = arith.constant 0 : index
    %c0_2 = arith.constant 0 : index
    %1 = vector.load %arg2[%c0_1, %c0_2] : memref<64x128xf32, #tpu.memory_space<vmem>>, vector<64x128xf32>
    %cst = arith.constant dense<0.000000e+00> : vector<8x128xf32>
    %2 = tpu.matmul %0, %1, %cst {dimension_numbers = #tpu.dot_dimension_numbers<[1], [0], [0], [1], [0, 0, 1, 1], [], []>} : vector<8x64xf32>, vector<64x128xf32>, vector<8x128xf32> -> vector<8x128xf32>
    %c0_3 = arith.constant 0 : index
    %c0_4 = arith.constant 0 : index
    %3 = vector.load %arg5[%c0_3, %c0_4] : memref<3x128xf32, #tpu.memory_space<vmem>>, vector<1x128xf32>
    %4 = vector.broadcast %3 : vector<1x128xf32> to vector<8x128xf32>
    %5 = arith.addf %2, %4 : vector<8x128xf32>
    %cst_5 = arith.constant 0.000000e+00 : f32
    %6 = vector.broadcast %cst_5 : f32 to vector<8x128xf32>
    %7 = arith.maximumf %5, %6 : vector<8x128xf32>
    %c0_6 = arith.constant 0 : index
    %c0_7 = arith.constant 0 : index
    %8 = vector.load %arg3[%c0_6, %c0_7] : memref<128x128xf32, #tpu.memory_space<vmem>>, vector<128x128xf32>
    %cst_8 = arith.constant dense<0.000000e+00> : vector<8x128xf32>
    %9 = tpu.matmul %7, %8, %cst_8 {dimension_numbers = #tpu.dot_dimension_numbers<[1], [0], [0], [1], [0, 0, 1, 1], [], []>} : vector<8x128xf32>, vector<128x128xf32>, vector<8x128xf32> -> vector<8x128xf32>
    %c1 = arith.constant 1 : index
    %c0_9 = arith.constant 0 : index
    %10 = vector.load %arg5[%c1, %c0_9] : memref<3x128xf32, #tpu.memory_space<vmem>>, vector<1x128xf32>
    %11 = vector.broadcast %10 : vector<1x128xf32> to vector<8x128xf32>
    %12 = arith.addf %9, %11 : vector<8x128xf32>
    %cst_10 = arith.constant 0.000000e+00 : f32
    %13 = vector.broadcast %cst_10 : f32 to vector<8x128xf32>
    %14 = arith.maximumf %12, %13 : vector<8x128xf32>
    %c0_11 = arith.constant 0 : index
    %c0_12 = arith.constant 0 : index
    %15 = vector.load %arg4[%c0_11, %c0_12] : memref<128x10xf32, #tpu.memory_space<vmem>>, vector<128x10xf32>
    %cst_13 = arith.constant dense<0.000000e+00> : vector<8x10xf32>
    %16 = tpu.matmul %14, %15, %cst_13 {dimension_numbers = #tpu.dot_dimension_numbers<[1], [0], [0], [1], [0, 0, 1, 1], [], []>} : vector<8x128xf32>, vector<128x10xf32>, vector<8x10xf32> -> vector<8x10xf32>
    %c2 = arith.constant 2 : index
    %c0_14 = arith.constant 0 : index
    %17 = vector.load %arg5[%c2, %c0_14] : memref<3x128xf32, #tpu.memory_space<vmem>>, vector<1x10xf32>
    %18 = vector.broadcast %17 : vector<1x10xf32> to vector<8x10xf32>
    %19 = arith.addf %16, %18 : vector<8x10xf32>
    %c0_15 = arith.constant 0 : index
    %c0_16 = arith.constant 0 : index
    %20 = vector.load %arg6[%c0_15, %c0_16] : memref<8x10xf32, #tpu.memory_space<vmem>>, vector<8x10xf32>
    tpu.vector_store %arg6[%c0_15, %c0_16], %19 {strides = array<i32>} : memref<8x10xf32, #tpu.memory_space<vmem>>, vector<8x10xf32>,
    return
  }
  func.func @transform_0(%arg0: i32) -> (i32, i32) {
    %c0_i32 = arith.constant 0 : i32
    %c0_i32_0 = arith.constant 0 : i32
    return %arg0, %c0_i32 : i32, i32
  }
  func.func @transform_1(%arg0: i32) -> (i32, i32) {
    %c0_i32 = arith.constant 0 : i32
    %c0_i32_0 = arith.constant 0 : i32
    %c0_i32_1 = arith.constant 0 : i32
    return %c0_i32, %c0_i32_0 : i32, i32
  }
  func.func @transform_2(%arg0: i32) -> (i32, i32) {
    %c0_i32 = arith.constant 0 : i32
    %c0_i32_0 = arith.constant 0 : i32
    %c0_i32_1 = arith.constant 0 : i32
    return %c0_i32, %c0_i32_0 : i32, i32
  }
  func.func @transform_3(%arg0: i32) -> (i32, i32) {
    %c0_i32 = arith.constant 0 : i32
    %c0_i32_0 = arith.constant 0 : i32
    %c0_i32_1 = arith.constant 0 : i32
    return %c0_i32, %c0_i32_0 : i32, i32
  }
  func.func @transform_4(%arg0: i32) -> (i32, i32) {
    %c0_i32 = arith.constant 0 : i32
    %c0_i32_0 = arith.constant 0 : i32
    %c0_i32_1 = arith.constant 0 : i32
    return %c0_i32, %c0_i32_0 : i32, i32
  }
  func.func @transform_5(%arg0: i32) -> (i32, i32) {
    %c0_i32 = arith.constant 0 : i32
    %c0_i32_0 = arith.constant 0 : i32
    return %arg0, %c0_i32 : i32, i32
  }
}

</mosaic_0001>

<bundles_post_ra>
// kernel: tpu_custom_call.1
= control target key start
LH: loop header
LB: loop body
LE: loop exit
PB: predicated region body
PF: predicated region fallthrough
CT: control target
= control target key end

     0   :  { %10 = vsyncpa [#allocation3], 0  ;;  %s767_s0 = inlined_call_operand.vmem [shape: f32[8,64], index: 0, kind: input, shape index: {}]   ;;  %s768_s1 = inlined_call_operand.hbm [shape: f32[64,128], index: 1, kind: input, shape index: {}]   ;;  %s769_s2 = inlined_call_operand.vmem [shape: f32[128,128], index: 2, kind: input, shape index: {}]   ;;  %s770_s3 = inlined_call_operand.vmem [shape: f32[128,10], index: 3, kind: input, shape index: {}]   ;;  %s771_s4 = inlined_call_operand.vmem [shape: f32[3,128], index: 4, kind: input, shape index: {}]   ;;  %s772_s5 = inlined_call_operand.hbm [shape: f32[8,10], index: 5, kind: output, shape index: {}]  }
   0x1   :  { %11 = vsyncpa [#allocation4], 0  ;;  %s575_s18 = smov [#allocation2]   ;;  %s527_s22 = scalar_lea.hbm %s768_s1, 1024 }
   0x2   :  { %s19_s19 = sshll.u32 %s575_s18, 4  ;;  %p528_p0 = scmp.ne.s32.totalorder %s768_s1, %s527_s22  ;;  %s20_s19 = int_to_ptr.vmem [resolvable:$true] %s19_s19 }
   0x3   :  { %p531_p1 = scmp.lt.u32.totalorder %s527_s22, %s768_s1 }
   0x5   :  { %p533_p2 = pnand %p531_p1, %p528_p0 }
   0x7   :  { %536 = shalt.err (!%p533_p2)
}
   0x8   :  { %s537_s27 = scalar_lea.vmem %s20_s19, 1024  ;;  %p542_p4 = scmp.lt.s32.totalorder %s20_s19, %s20_s19 }
   0x9   :  { %p538_p3 = scmp.ne.s32.totalorder %s20_s19, %s537_s27  ;;  %p543_p5 = scmp.lt.s32.totalorder %s537_s27, %s537_s27 }
   0xb   :  { %p544_p6 = por %p543_p5, %p542_p4 }
   0xd   :  { %p545_p7 = pnand %p544_p6, %p538_p3 }
   0xf   :  { %548 = shalt.err (!%p545_p7)
}
  0x10   :  { %s576_s28 = smov 128   ;;  %s577_s29 = smov 8  }
  0x11   :  { %25 = dma.hbm_to_vmem [thread:$0]  %s768_s1, 1024, %s20_s19, [#allocation3], %s576_s28, %s576_s28, %s577_s29  }
  0x12   :  { %571 = dma.done.wait [#allocation3], 1024  }
  0x13   :  { %572 = vsyncadd [#allocation3], 4294966272  ;;  %v578_v0 = vmov 0.0|0.0   ;;  %vm579_vm0 = vmmov 0   ;;  %v580_v1 = vmov 0.0   ;;  %v36_v2 = vld [vmem:[#allocation2] sm:$0xff] }
  0x14   :  { %460 = vmatprep.subr.bf16.mxu0 %v578_v0  ;;  %387 = vmatprep.mubr.msk.f32.mxu0 %vm579_vm0, %v580_v1  ;;  %v37_v3 = vld [vmem:[#allocation2 + $0x8] sm:$0xff]  ;;  %v38_v4 = vld [vmem:[#allocation2 + $0x10] sm:$0xff]  ;;  %v39_v6 = vld [vmem:[#allocation2 + $0x18] sm:$0xff]  ;;  %vm49_vm1 = vcmask 523264   ;;  %s581_s22 = smov [#allocation5]   ;;  %vm307_vm2 = vcmask 80896  }
  0x15   :  { %472 = vmatprep.subr.bf16.mxu1 %v578_v0  ;;  %422 = vmatprep.mubr.msk.f32.mxu1 %vm579_vm0, %v580_v1  ;;  %v461_v5 = vpack.c.bf16 %v37_v3, %v36_v2  ;;  %v464_v7 = vpack.c.bf16 %v39_v6, %v38_v4  ;;  %v124_v8 = vld [vmem:[%s769_s2] sm:$0xff]  ;;  %v125_v9 = vld [vmem:[%s769_s2 + $0x8] sm:$0xff]  ;;  %v126_v10 = vld [vmem:[%s769_s2 + $0x10] sm:$0xff]  ;;  %s315_s23 = sshll.u32 %s581_s22, 4  ;;  %s316_s23 = int_to_ptr.vmem [resolvable:$true] %s315_s23 }
  0x16   :  { %v40_v11 = vld [vmem:[#allocation2 + $0x20] sm:$0xff]  ;;  %v41_v12 = vld [vmem:[#allocation2 + $0x28] sm:$0xff]  ;;  %v473_v13 = vpack.c.bf16 %v125_v9, %v124_v8  ;;  %v127_v14 = vld [vmem:[%s769_s2 + $0x18] sm:$0xff]  ;;  %p554_p9 = scmp.lt.s32.totalorder %s316_s23, %s316_s23 }
  0x17   :  { %462 = vmatpush3.bf16.msra.mxu0 %v461_v5  ;;  %v476_v15 = vpack.c.bf16 %v127_v14, %v126_v10  ;;  %v467_v16 = vpack.c.bf16 %v41_v12, %v40_v11  ;;  %v128_v17 = vld [vmem:[%s769_s2 + $0x20] sm:$0xff]  ;;  %v129_v18 = vld [vmem:[%s769_s2 + $0x28] sm:$0xff]  ;;  %v42_v19 = vld [vmem:[#allocation2 + $0x30] sm:$0xff] }
  0x18   :  { %463 = vmatprep.subr.bf16.mxu0 %v578_v0  ;;  %474 = vmatpush3.bf16.msra.mxu1 %v473_v13  ;;  %v43_v20 = vld [vmem:[#allocation2 + $0x38] sm:$0xff]  ;;  %v479_v21 = vpack.c.bf16 %v129_v18, %v128_v17  ;;  %v130_v23 = vld [vmem:[%s769_s2 + $0x30] sm:$0xff]  ;;  %v35_v26 = vld [vmem:[%s767_s0] sm:$0xff] }
  0x19   :  { %475 = vmatprep.subr.bf16.mxu1 %v578_v0  ;;  %v470_v22 = vpack.c.bf16 %v43_v20, %v42_v19  ;;  %v131_v24 = vld [vmem:[%s769_s2 + $0x38] sm:$0xff]  ;;  %v132_v27 = vld [vmem:[%s769_s2 + $0x40] sm:$0xff]  ;;  %v133_v28 = vld [vmem:[%s769_s2 + $0x48] sm:$0xff] }
  0x1a   :  { %v482_v25 = vpack.c.bf16 %v131_v24, %v130_v23  ;;  %v485_v29 = vpack.c.bf16 %v133_v28, %v132_v27  ;;  %v134_v30 = vld [vmem:[%s769_s2 + $0x50] sm:$0xff]  ;;  %v135_v31 = vld [vmem:[%s769_s2 + $0x58] sm:$0xff]  ;;  %v136_v33 = vld [vmem:[%s769_s2 + $0x60] sm:$0xff] }
  0x1b   :  { %465 = vmatpush3.bf16.msra.mxu0 %v464_v7  ;;  %v488_v32 = vpack.c.bf16 %v135_v31, %v134_v30  ;;  %v137_v34 = vld [vmem:[%s769_s2 + $0x68] sm:$0xff]  ;;  %v138_v36 = vld [vmem:[%s769_s2 + $0x70] sm:$0xff]  ;;  %v139_v37 = vld [vmem:[%s769_s2 + $0x78] sm:$0xff] }
  0x1c   :  { %466 = vmatprep.subr.bf16.mxu0 %v578_v0  ;;  %477 = vmatpush3.bf16.msra.mxu1 %v476_v15  ;;  %v491_v35 = vpack.c.bf16 %v137_v34, %v136_v33  ;;  %v494_v38 = vpack.c.bf16 %v139_v37, %v138_v36  ;;  %v216_v39 = vld [vmem:[%s770_s3] sm:$0xff]  ;;  %v217_v40 = vld [vmem:[%s770_s3 + $0x8] sm:$0xff]  ;;  %v218_v41 = vld [vmem:[%s770_s3 + $0x10] sm:$0xff] }
  0x1d   :  { %478 = vmatprep.subr.bf16.mxu1 %v578_v0  ;;  %v497_v42 = vpack.c.bf16 %v217_v40, %v216_v39  ;;  %v219_v43 = vld [vmem:[%s770_s3 + $0x18] sm:$0xff]  ;;  %v220_v45 = vld [vmem:[%s770_s3 + $0x20] sm:$0xff]  ;;  %v221_v46 = vld [vmem:[%s770_s3 + $0x28] sm:$0xff] }
  0x1e   :  { %v500_v44 = vpack.c.bf16 %v219_v43, %v218_v41  ;;  %v503_v47 = vpack.c.bf16 %v221_v46, %v220_v45  ;;  %v222_v48 = vld [vmem:[%s770_s3 + $0x30] sm:$0xff]  ;;  %v223_v49 = vld [vmem:[%s770_s3 + $0x38] sm:$0xff]  ;;  %v224_v51 = vld [vmem:[%s770_s3 + $0x40] sm:$0xff] }
  0x1f   :  { %468 = vmatpush3.bf16.msra.mxu0 %v467_v16  ;;  %v506_v50 = vpack.c.bf16 %v223_v49, %v222_v48  ;;  %v225_v52 = vld [vmem:[%s770_s3 + $0x48] sm:$0xff]  ;;  %v226_v54 = vld [vmem:[%s770_s3 + $0x50] sm:$0xff]  ;;  %v227_v55 = vld [vmem:[%s770_s3 + $0x58] sm:$0xff] }
  0x20   :  { %469 = vmatprep.subr.bf16.mxu0 %v578_v0  ;;  %480 = vmatpush3.bf16.msra.mxu1 %v479_v21  ;;  %v509_v53 = vpack.c.bf16 %v225_v52, %v224_v51  ;;  %v512_v56 = vpack.c.bf16 %v227_v55, %v226_v54  ;;  %v228_v57 = vld [vmem:[%s770_s3 + $0x60] sm:$0xff]  ;;  %v229_v58 = vld [vmem:[%s770_s3 + $0x68] sm:$0xff]  ;;  %v230_v2 = vld [vmem:[%s770_s3 + $0x70] sm:$0xff] }
  0x21   :  { %481 = vmatprep.subr.bf16.mxu1 %v578_v0  ;;  %v515_v59 = vpack.c.bf16 %v229_v58, %v228_v57  ;;  %v324_v60 = vld [vmem:[%s771_s4] ss:$0 sm:$0xff]  ;;  %v231_v3 = vld [vmem:[%s770_s3 + $0x78] sm:$0xff]  ;;  %v327_v9 = vld [vmem:[%s771_s4 + $0x2] ss:$0 sm:$0xff]  ;;  %s549_s3 = scalar_lea.vmem %s316_s23, 128 }
  0x22   :  { %v518_v4 = vpack.c.bf16 %v231_v3, %v230_v2  ;;  %p550_p8 = scmp.ne.s32.totalorder %s316_s23, %s549_s3  ;;  %p555_p10 = scmp.lt.s32.totalorder %s549_s3, %s549_s3 }
  0x23   :  { %471 = vmatpush3.bf16.msra.mxu0 %v470_v22 }
  0x24   :  { %496 = vmatprep.subr.bf16.mxu0 %v578_v0  ;;  %483 = vmatpush3.bf16.msra.mxu1 %v482_v25  ;;  %p556_p11 = por %p555_p10, %p554_p9 }
  0x25   :  { %484 = vmatprep.subr.bf16.mxu1 %v578_v0 }
  0x26   :  { %388 = vmatmul.mubr.msk.f32.vlgmr.msra.gmra.mrb[0].mxu0 %vm49_vm1, %v35_v26  ;;  %p557_p12 = pnand %p556_p11, %p550_p8 }
  0x27   :  { %457 = vmatprep.mubr.msk.f32.mxu0 %vm579_vm0, %v580_v1  ;;  %498 = vmatpush3.bf16.msra.mxu0 %v497_v42 }
  0x28   :  { %486 = vmatpush3.bf16.msra.mxu1 %v485_v29  ;;  %499 = vmatprep.subr.bf16.mxu0 %v578_v0 }
  0x29   :  { %487 = vmatprep.subr.bf16.mxu1 %v578_v0 }
  0x2b   :  { %501 = vmatpush3.bf16.msra.mxu0 %v500_v44 }
  0x2c   :  { %489 = vmatpush3.bf16.msra.mxu1 %v488_v32  ;;  %502 = vmatprep.subr.bf16.mxu0 %v578_v0 }
  0x2d   :  { %490 = vmatprep.subr.bf16.mxu1 %v578_v0 }
  0x2f   :  { %504 = vmatpush3.bf16.msra.mxu0 %v503_v47 }
  0x30   :  { %492 = vmatpush3.bf16.msra.mxu1 %v491_v35  ;;  %505 = vmatprep.subr.bf16.mxu0 %v578_v0 }
  0x31   :  { %493 = vmatprep.subr.bf16.mxu1 %v578_v0 }
  0x33   :  { %507 = vmatpush3.bf16.msra.mxu0 %v506_v50 }
  0x34   :  { %495 = vmatpush3.bf16.msra.mxu1 %v494_v38  ;;  %508 = vmatprep.subr.bf16.mxu0 %v578_v0 }
  0x37   :  { %510 = vmatpush3.bf16.msra.mxu0 %v509_v53 }
  0x38   :  { %511 = vmatprep.subr.bf16.mxu0 %v578_v0 }
  0x3b   :  { %513 = vmatpush3.bf16.msra.mxu0 %v512_v56 }
  0x3c   :  { %514 = vmatprep.subr.bf16.mxu0 %v578_v0 }
  0x3f   :  { %516 = vmatpush3.bf16.msra.mxu0 %v515_v59 }
  0x40   :  { %517 = vmatprep.subr.bf16.mxu0 %v578_v0  ;;  %v326_v0 = vld [vmem:[%s771_s4 + $0x1] ss:$0 sm:$0xff] }
  0x43   :  { %519 = vmatpush3.bf16.msra.mxu0 %v518_v4 }
  0xf9   :  { %v119_v61 = vpop.f32.mrb[0].mxu0 }
  0xfa   :  { %v120_v62 = vadd.f32 %v324_v60, %v119_v61  ;;  %v389_v63 = vpop.f32.mrb[1].mxu0 }
  0xfc   :  { %v123_v1 = vmax.f32 %v120_v62, 0.0 }
  0xfe   :  { %423 = vmatmul.mubr.f32.vlgmr.msra.gmra.mrb[0].mxu1 %v123_v1 }
 0x1d1   :  { %v211_v5 = vpop.f32.mrb[0].mxu1 }
 0x1d2   :  { %v212_v6 = vadd.f32 %v326_v0, %v211_v5  ;;  %v424_v7 = vpop.f32.mrb[1].mxu1 }
 0x1d4   :  { %v215_v8 = vmax.f32 %v212_v6, 0.0 }
 0x1d6   :  { %458 = vmatmul.mubr.f32.vlgmr.msra.gmra.mrb[2].mxu0 %v215_v8 }
 0x2a9   :  { %v303_v10 = vpop.f32.mrb[2].mxu0 }
 0x2aa   :  { %v304_v11 = vadd.f32 %v327_v9, %v303_v10  ;;  %v459_v12 = vpop.f32.mrb[3].mxu0 }
 0x2ac   :  { %308 = vst.msk [vmem:[#allocation5] sm:$0xff] %vm307_vm2, %v304_v11 }
 0x2ad   :  { %560 = shalt.err (!%p557_p12)
}
 0x2ae   :  { %s561_s26 = scalar_lea.hbm %s772_s5, 128 }
 0x2af   :  { %p562_p13 = scmp.ne.s32.totalorder %s772_s5, %s561_s26  ;;  %p565_p0 = scmp.lt.u32.totalorder %s561_s26, %s772_s5 }
 0x2b1   :  { %p567_p1 = pnand %p565_p0, %p562_p13 }
 0x2b3   :  { %570 = shalt.err (!%p567_p1)
}
 0x2b4   :  { %318 = dma.vmem_to_hbm [thread:$0]  %s316_s23, 128, %s772_s5, [#allocation4]  }
 0x2b5   :  { %573 = dma.done.wait [#allocation4], 128  }
 0x2b6   :  { %574 = vsyncadd [#allocation4], 4294967168 }
 0x2b7   :  { %322 = vsyncpa [#allocation3], 1 }
 0x2b8   :  { %323 = vsyncpa [#allocation4], 1 }

</bundles_post_ra>
